<compile_context>
chip_gen: v6e
topology: v6e:2x2x1
jax: 0.10.0
libtpu: 0.0.40
codegen_flags: <defaults>
</compile_context>

<pallas_src>
import jax
import jax.numpy as jnp
from jax.experimental import pallas as pl
from jax.experimental.pallas import tpu as pltpu

EPS = 1e-5


def _round_up(a, b):
    return ((a + b - 1) // b) * b


def _cdiv(a, b):
    return (a + b - 1) // b


# ---------------------------------------------------------------------------
# Fast path: gamma-folded W resident in VMEM.  Grid = (groups [parallel],
# tiles_per_group + 1 [arbitrary]).  Step i of a group normalizes row tile i
# (into scratch slot i%2) while the MXU multiplies row tile i-1 (slot (i-1)%2)
# against the resident W — independent work, so VPU and MXU overlap.
# ---------------------------------------------------------------------------
def _prenorm_resident_kernel(x_ref, w_ref, b_ref, o_ref, y_ref):
    i = pl.program_id(1)
    last = pl.num_programs(1) - 1        # == tiles_per_group
    slot_cur = i % 2
    slot_prev = (i + 1) % 2              # == (i - 1) % 2 for a 2-slot ring

    def layernorm():
        x = x_ref[...].astype(jnp.float32)
        mean = jnp.mean(x, axis=-1, keepdims=True)
        xc = x - mean
        var = jnp.mean(xc * xc, axis=-1, keepdims=True)   # two-pass variance
        y_ref[slot_cur] = (xc * jax.lax.rsqrt(var + EPS)).astype(y_ref.dtype)

    def matmul():
        out = jnp.dot(y_ref[slot_prev], w_ref[...],
                      preferred_element_type=jnp.float32)
        o_ref[...] = (out + b_ref[...]).astype(o_ref.dtype)

    @pl.when(jnp.logical_and(i > 0, i < last))
    def _():
        # Steady state: previous tile's matmul (MXU) + this tile's LayerNorm
        # (VPU/EUP/XLU) in one straight-line block -> co-issued.
        matmul()
        layernorm()

    @pl.when(i == 0)
    def _():
        layernorm()      # pipeline prologue: LayerNorm only

    @pl.when(i == last)
    def _():
        matmul()         # pipeline drain: matmul only


# ---------------------------------------------------------------------------
# Fallback path for D too large for a resident W: 2-D grid (row tiles x W
# column tiles); LayerNorm is computed once per row tile (j == 0), cached in
# VMEM, and reused across all column tiles.
# ---------------------------------------------------------------------------
def _prenorm_streaming_kernel(x_ref, w_ref, b_ref, o_ref, y_ref):
    j = pl.program_id(1)

    @pl.when(j == 0)
    def _():
        x = x_ref[...].astype(jnp.float32)
        mean = jnp.mean(x, axis=-1, keepdims=True)
        xc = x - mean
        var = jnp.mean(xc * xc, axis=-1, keepdims=True)
        y_ref[...] = (xc * jax.lax.rsqrt(var + EPS)).astype(y_ref.dtype)

    # TODO(synk): this path still serializes the j==0 LayerNorm against the
    # MXU; a 2-slot look-ahead (as in the resident path) would hide it.
    out = jnp.dot(y_ref[...], w_ref[...], preferred_element_type=jnp.float32)
    o_ref[...] = (out + b_ref[...]).astype(o_ref.dtype)


def prenorm_linear(x, gamma, beta, w, b, *, prefer_bf16_matmul=False):
    """PreNorm with fn = Linear(D, D): LayerNorm(x) @ W + b, fused.

    x: (B, S, D); w: (D, D) stored input-major (y @ W); returns (B, S, D).
    The matmul runs in W's dtype (pass bf16 W for the native MXU path);
    prefer_bf16_matmul=True additionally casts f32 weights/activations to bf16
    operands (accumulation stays f32) for ~3x MXU throughput.
    """
    B, S, D = x.shape
    assert w.shape == (D, D)
    M = B * S

    compute_dtype = w.dtype
    if prefer_bf16_matmul and compute_dtype == jnp.float32:
        compute_dtype = jnp.bfloat16

    # --- Fold the LayerNorm affine into the linear layer (exact algebra):
    #     (xn*gamma + beta) @ W + b == xn @ (gamma[:,None]*W) + (beta @ W + b)
    gamma_f = gamma.reshape(D).astype(jnp.float32)
    beta_f = beta.reshape(D).astype(jnp.float32)
    w_f32 = w.astype(jnp.float32)
    w_fold = (gamma_f[:, None] * w_f32).astype(compute_dtype)
    b_fold = (beta_f @ w_f32 + b.reshape(D).astype(jnp.float32)).reshape(1, D)

    x2 = x.reshape(M, D)
    isz = lambda dt: jnp.dtype(dt).itemsize

    # --- Per-generation VMEM budget (128 MiB on v5e/v6e, 64 MiB on v7x).
    try:
        vmem_cap = int(getattr(pltpu.get_tpu_info(), "vmem_capacity_bytes",
                               64 * 1024 * 1024))
    except Exception:  # pragma: no cover - conservative fallback
        vmem_cap = 64 * 1024 * 1024
    budget = int(vmem_cap * 0.85)   # headroom for compiler-internal scratch

    # --- Row tile: large enough to amortize the ~0.35us per-step overhead,
    # clamped so there are >= 2 row tiles (keeps both v7x TensorCores busy)
    # and so the working set fits this generation's VMEM.
    sub = 16 if (x.dtype == jnp.bfloat16 or compute_dtype == jnp.bfloat16) else 8
    tm = 512 if compute_dtype == jnp.bfloat16 else 256
    tm = max(sub, min(tm, _round_up(M, sub)))
    if M >= 2 * sub:
        tm = min(tm, _round_up(_cdiv(M, 2), sub))

    def resident_need(tm_):
        return (2 * tm_ * D * isz(x.dtype)           # x tiles (double-buffered)
                + 2 * D * D * isz(compute_dtype)     # resident W (2 buffers)
                + 2 * tm_ * D * isz(x.dtype)         # output tiles
                + 2 * tm_ * D * isz(compute_dtype)   # 2-slot LN scratch
                + 2 * D * 4)                         # folded bias

    while resident_need(tm) > budget and tm > sub:
        tm = max(sub, _round_up(tm // 2, sub))
    use_resident = resident_need(tm) <= budget

    if use_resident:
        GM = _cdiv(M, tm)                # row tiles (partial last tile is OK)
        NG = 2 if GM >= 2 else 1         # groups -> v7x core parallelism
        TPG = _cdiv(GM, NG)              # tiles per group
        grid = (NG, TPG + 1)             # +1 step: pipeline fill/drain

        def x_index(g, i):
            # x tile whose LayerNorm is computed at step (g, i); clamped so
            # drain steps / short last group just re-read the previous tile.
            return (jnp.minimum(g * TPG + jnp.minimum(i, TPG - 1), GM - 1), 0)

        def o_index(g, i):
            # output tile written at step (g, i) (the previous tile's matmul).
            return (jnp.minimum(g * TPG + jnp.maximum(i - 1, 0), GM - 1), 0)

        vmem_need = resident_need(tm)
        cost = pl.CostEstimate(
            flops=2 * M * D * D + 8 * M * D,
            transcendentals=M,
            bytes_accessed=(M * D * isz(x.dtype)            # x read
                            + D * D * isz(compute_dtype)    # W read once
                            + M * D * isz(x.dtype)          # output write
                            + D * 4),                       # bias
        )

        # TODO(synk): single-buffer the constant-index W / bias blocks via
        # pipeline_mode=pl.Buffered(1) to halve their VMEM footprint on v7x.
        out = pl.pallas_call(
            _prenorm_resident_kernel,
            out_shape=jax.ShapeDtypeStruct((M, D), x.dtype),
            grid_spec=pltpu.PrefetchScalarGridSpec(
                num_scalar_prefetch=0,
                grid=grid,
                in_specs=[
                    pl.BlockSpec((tm, D), x_index),             # x (look-ahead)
                    pl.BlockSpec((D, D), lambda g, i: (0, 0)),  # folded W, resident
                    pl.BlockSpec((1, D), lambda g, i: (0, 0)),  # folded bias
                ],
                out_specs=pl.BlockSpec((tm, D), o_index),
                scratch_shapes=[pltpu.VMEM((2, tm, D), compute_dtype)],
            ),
            compiler_params=pltpu.CompilerParams(
                # Group axis is independent (multi-TC parts shard it); the
                # inner axis carries the LN look-ahead -> "arbitrary".
                dimension_semantics=("parallel", "arbitrary"),
                vmem_limit_bytes=int(min(vmem_cap, vmem_need + (32 << 20))),
            ),
            cost_estimate=cost,
        )(x2, w_fold, b_fold)
    else:
        # --- Streaming fallback: W does not fit VMEM; stream (D, tn) column
        # tiles with the LayerNorm result cached per row tile.
        tn = min(512, _round_up(D, 128))

        def stream_need(tm_, tn_):
            return (2 * tm_ * D * isz(x.dtype)
                    + 2 * D * tn_ * isz(compute_dtype)
                    + 2 * tm_ * tn_ * isz(x.dtype)
                    + tm_ * D * isz(compute_dtype)
                    + 2 * tn_ * 4)

        while stream_need(tm, tn) > budget and tm > sub:
            tm = max(sub, _round_up(tm // 2, sub))
        while stream_need(tm, tn) > budget and tn > 128:
            tn = max(128, tn // 2)

        GM = _cdiv(M, tm)
        GN = _cdiv(D, tn)
        vmem_need = stream_need(tm, tn)
        cost = pl.CostEstimate(
            flops=2 * M * D * D + 8 * M * D,
            transcendentals=M,
            bytes_accessed=(M * D * isz(x.dtype)
                            + GM * D * D * isz(compute_dtype)  # W re-streamed / row tile
                            + M * D * isz(x.dtype)
                            + D * 4),
        )

        out = pl.pallas_call(
            _prenorm_streaming_kernel,
            out_shape=jax.ShapeDtypeStruct((M, D), x.dtype),
            grid_spec=pltpu.PrefetchScalarGridSpec(
                num_scalar_prefetch=0,
                grid=(GM, GN),
                in_specs=[
                    pl.BlockSpec((tm, D), lambda i, j: (i, 0)),   # x rows
                    pl.BlockSpec((D, tn), lambda i, j: (0, j)),   # W column tile
                    pl.BlockSpec((1, tn), lambda i, j: (0, j)),   # bias column tile
                ],
                out_specs=pl.BlockSpec((tm, tn), lambda i, j: (i, j)),
                scratch_shapes=[pltpu.VMEM((tm, D), compute_dtype)],
            ),
            compiler_params=pltpu.CompilerParams(
                dimension_semantics=("parallel", "arbitrary"),
                vmem_limit_bytes=int(min(vmem_cap, vmem_need + (32 << 20))),
            ),
            cost_estimate=cost,
        )(x2, w_fold, b_fold)

    return out.reshape(B, S, D)


def _reference(x, gamma, beta, w, b):
    xf = x.astype(jnp.float32)
    mean = jnp.mean(xf, axis=-1, keepdims=True)
    var = jnp.mean((xf - mean) ** 2, axis=-1, keepdims=True)
    y = (xf - mean) / jnp.sqrt(var + EPS) * gamma + beta
    out = jnp.dot(y.astype(w.dtype), w, preferred_element_type=jnp.float32) + b
    return out.astype(x.dtype)


if __name__ == "__main__":
    key = jax.random.PRNGKey(0)
    kx, kw, kb, kg, kbt, kx2, kw2, kb2, kg2, kbt2 = jax.random.split(key, 10)

    # --- Case 1: small f32 case matching the module spec (embed_dim = 128),
    #     non-trivial gamma/beta to exercise the affine fold. ---
    B, S, D = 2, 8, 128
    x = jax.random.normal(kx, (B, S, D), dtype=jnp.float32)
    gamma = 1.0 + 0.1 * jax.random.normal(kg, (D,), dtype=jnp.float32)
    beta = 0.05 * jax.random.normal(kbt, (D,), dtype=jnp.float32)
    w = jax.random.normal(kw, (D, D), dtype=jnp.float32) * 0.02
    b = jax.random.normal(kb, (D,), dtype=jnp.float32) * 0.01

    out = jax.block_until_ready(prenorm_linear(x, gamma, beta, w, b))
    ref = _reference(x, gamma, beta, w, b)
    assert out.shape == (B, S, D)
    assert jnp.allclose(out, ref, atol=2e-4, rtol=2e-4)

    # --- Case 2: bf16 MXU path, ragged rows (M not a tile multiple), resident
    #     W at D=1024, 2-group grid (exercises the look-ahead pipeline and the
    #     partial last row tile). ---
    B2, S2, D2 = 2, 100, 1024
    x_b = jax.random.normal(kx2, (B2, S2, D2), dtype=jnp.float32).astype(jnp.bfloat16)
    gamma_b = 1.0 + 0.1 * jax.random.normal(kg2, (D2,), dtype=jnp.float32)
    beta_b = 0.05 * jax.random.normal(kbt2, (D2,), dtype=jnp.float32)
    w_b = (jax.random.normal(kw2, (D2, D2), dtype=jnp.float32) * 0.02).astype(jnp.bfloat16)
    b_b = jax.random.normal(kb2, (D2,), dtype=jnp.float32) * 0.01

    out_b = jax.block_until_ready(prenorm_linear(x_b, gamma_b, beta_b, w_b, b_b))
    ref_b = _reference(x_b, gamma_b, beta_b, w_b, b_b)
    assert out_b.shape == (B2, S2, D2)
    assert jnp.allclose(out_b.astype(jnp.float32), ref_b.astype(jnp.float32),
                        atol=3e-2, rtol=5e-2)

    print("KERNEL_OK")
</pallas_src>

<mosaic_0001>
module attributes {stable_mosaic.version = 11 : i64} {
  func.func @_prenorm_resident_kernel(%arg0: i32, %arg1: i32, %arg2: memref<8x128xf32, #tpu.memory_space<vmem>>, %arg3: memref<128x128xf32, #tpu.memory_space<vmem>>, %arg4: memref<1x128xf32, #tpu.memory_space<vmem>>, %arg5: memref<8x128xf32, #tpu.memory_space<vmem>>, %arg6: memref<2x8x128xf32, #tpu.memory_space<vmem>>) attributes {dimension_semantics = [#tpu.dimension_semantics<parallel>, #tpu.dimension_semantics<arbitrary>], iteration_bounds = array<i64: 2, 2>, scalar_prefetch = 0 : i64, scratch_operands = 1 : i64, tpu.core_type = #tpu.core_type<tc>, window_params = [{transform_indices = @transform_0, window_bounds = array<i64: 8, 128>}, {pipeline_mode = #tpu.pipeline_mode<synchronous>, transform_indices = @transform_1, window_bounds = array<i64: 128, 128>}, {pipeline_mode = #tpu.pipeline_mode<synchronous>, transform_indices = @transform_2, window_bounds = array<i64: 1, 128>}, {transform_indices = @transform_3, window_bounds = array<i64: 8, 128>}]} {
    %c2_i32 = arith.constant 2 : i32
    %c0_i32 = arith.constant 0 : i32
    %0 = arith.cmpi eq, %c2_i32, %c0_i32 : i32
    %c1_i32 = arith.constant 1 : i32
    %1 = arith.select %0, %c1_i32, %c2_i32 : i32
    %2 = arith.remsi %arg1, %1 : i32
    %c0_i32_0 = arith.constant 0 : i32
    %3 = arith.cmpi ne, %2, %c0_i32_0 : i32
    %c0_i32_1 = arith.constant 0 : i32
    %4 = arith.cmpi slt, %2, %c0_i32_1 : i32
    %c0_i32_2 = arith.constant 0 : i32
    %5 = arith.cmpi slt, %1, %c0_i32_2 : i32
    %6 = arith.xori %4, %5 : i1
    %7 = arith.andi %6, %3 : i1
    %8 = arith.addi %2, %1 : i32
    %9 = arith.select %7, %8, %2 : i32
    %c1_i32_3 = arith.constant 1 : i32
    %10 = arith.addi %arg1, %c1_i32_3 : i32
    %c2_i32_4 = arith.constant 2 : i32
    %c0_i32_5 = arith.constant 0 : i32
    %11 = arith.cmpi eq, %c2_i32_4, %c0_i32_5 : i32
    %c1_i32_6 = arith.constant 1 : i32
    %12 = arith.select %11, %c1_i32_6, %c2_i32_4 : i32
    %13 = arith.remsi %10, %12 : i32
    %c0_i32_7 = arith.constant 0 : i32
    %14 = arith.cmpi ne, %13, %c0_i32_7 : i32
    %c0_i32_8 = arith.constant 0 : i32
    %15 = arith.cmpi slt, %13, %c0_i32_8 : i32
    %c0_i32_9 = arith.constant 0 : i32
    %16 = arith.cmpi slt, %12, %c0_i32_9 : i32
    %17 = arith.xori %15, %16 : i1
    %18 = arith.andi %17, %14 : i1
    %19 = arith.addi %13, %12 : i32
    %20 = arith.select %18, %19, %13 : i32
    %c0_i32_10 = arith.constant 0 : i32
    %21 = arith.cmpi sgt, %arg1, %c0_i32_10 : i32
    %c1_i32_11 = arith.constant 1 : i32
    %22 = arith.cmpi slt, %arg1, %c1_i32_11 : i32
    %23 = arith.andi %21, %22 : i1
    %24 = arith.extui %23 : i1 to i32
    %c0_i32_12 = arith.constant 0 : i32
    %25 = arith.cmpi ne, %24, %c0_i32_12 : i32
    scf.if %25 {
      %32 = arith.index_cast %20 : i32 to index
      %c0 = arith.constant 0 : index
      %c0_17 = arith.constant 0 : index
      %33 = vector.load %arg6[%32, %c0, %c0_17] : memref<2x8x128xf32, #tpu.memory_space<vmem>>, vector<1x8x128xf32>
      %34 = vector.shape_cast %33 : vector<1x8x128xf32> to vector<8x128xf32>
      %c0_18 = arith.constant 0 : index
      %c0_19 = arith.constant 0 : index
      %35 = vector.load %arg3[%c0_18, %c0_19] : memref<128x128xf32, #tpu.memory_space<vmem>>, vector<128x128xf32>
      %cst = arith.constant dense<0.000000e+00> : vector<8x128xf32>
      %36 = tpu.matmul %34, %35, %cst {dimension_numbers = #tpu.dot_dimension_numbers<[1], [0], [0], [1], [0, 0, 1, 1], [], []>} : vector<8x128xf32>, vector<128x128xf32>, vector<8x128xf32> -> vector<8x128xf32>
      %c0_20 = arith.constant 0 : index
      %c0_21 = arith.constant 0 : index
      %37 = vector.load %arg4[%c0_20, %c0_21] : memref<1x128xf32, #tpu.memory_space<vmem>>, vector<1x128xf32>
      %38 = vector.broadcast %37 : vector<1x128xf32> to vector<8x128xf32>
      %39 = arith.addf %36, %38 : vector<8x128xf32>
      %c0_22 = arith.constant 0 : index
      %c0_23 = arith.constant 0 : index
      %40 = vector.load %arg5[%c0_22, %c0_23] : memref<8x128xf32, #tpu.memory_space<vmem>>, vector<8x128xf32>
      tpu.vector_store %arg5[%c0_22, %c0_23], %39 {strides = array<i32>} : memref<8x128xf32, #tpu.memory_space<vmem>>, vector<8x128xf32>,
      %c0_24 = arith.constant 0 : index
      %c0_25 = arith.constant 0 : index
      %41 = vector.load %arg2[%c0_24, %c0_25] : memref<8x128xf32, #tpu.memory_space<vmem>>, vector<8x128xf32>
      %cst_26 = arith.constant dense<0.000000e+00> : vector<8xf32>
      %42 = vector.multi_reduction <add>, %41, %cst_26 [1] : vector<8x128xf32> to vector<8xf32>
      %43 = vector.shape_cast %42 : vector<8xf32> to vector<8x1xf32>
      %cst_27 = arith.constant 1.280000e+02 : f32
      %44 = vector.broadcast %cst_27 : f32 to vector<8x1xf32>
      %45 = arith.divf %43, %44 : vector<8x1xf32>
      %46 = vector.broadcast %45 : vector<8x1xf32> to vector<8x128xf32>
      %47 = arith.subf %41, %46 : vector<8x128xf32>
      %48 = arith.mulf %47, %47 : vector<8x128xf32>
      %cst_28 = arith.constant dense<0.000000e+00> : vector<8xf32>
      %49 = vector.multi_reduction <add>, %48, %cst_28 [1] : vector<8x128xf32> to vector<8xf32>
      %50 = vector.shape_cast %49 : vector<8xf32> to vector<8x1xf32>
      %cst_29 = arith.constant 1.280000e+02 : f32
      %51 = vector.broadcast %cst_29 : f32 to vector<8x1xf32>
      %52 = arith.divf %50, %51 : vector<8x1xf32>
      %cst_30 = arith.constant 9.99999974E-6 : f32
      %53 = vector.broadcast %cst_30 : f32 to vector<8x1xf32>
      %54 = arith.addf %52, %53 : vector<8x1xf32>
      %55 = math.rsqrt %54 : vector<8x1xf32>
      %56 = vector.broadcast %55 : vector<8x1xf32> to vector<8x128xf32>
      %57 = arith.mulf %47, %56 : vector<8x128xf32>
      %58 = arith.index_cast %9 : i32 to index
      %c0_31 = arith.constant 0 : index
      %c0_32 = arith.constant 0 : index
      %59 = vector.load %arg6[%58, %c0_31, %c0_32] : memref<2x8x128xf32, #tpu.memory_space<vmem>>, vector<1x8x128xf32>
      %60 = vector.shape_cast %59 : vector<1x8x128xf32> to vector<8x128xf32>
      %61 = vector.shape_cast %57 : vector<8x128xf32> to vector<1x8x128xf32>
      tpu.vector_store %arg6[%58, %c0_31, %c0_32], %61 {strides = array<i32>} : memref<2x8x128xf32, #tpu.memory_space<vmem>>, vector<1x8x128xf32>,
    } else {
    }
    %c0_i32_13 = arith.constant 0 : i32
    %26 = arith.cmpi eq, %arg1, %c0_i32_13 : i32
    %27 = arith.extui %26 : i1 to i32
    %c0_i32_14 = arith.constant 0 : i32
    %28 = arith.cmpi ne, %27, %c0_i32_14 : i32
    scf.if %28 {
      %c0 = arith.constant 0 : index
      %c0_17 = arith.constant 0 : index
      %32 = vector.load %arg2[%c0, %c0_17] : memref<8x128xf32, #tpu.memory_space<vmem>>, vector<8x128xf32>
      %cst = arith.constant dense<0.000000e+00> : vector<8xf32>
      %33 = vector.multi_reduction <add>, %32, %cst [1] : vector<8x128xf32> to vector<8xf32>
      %34 = vector.shape_cast %33 : vector<8xf32> to vector<8x1xf32>
      %cst_18 = arith.constant 1.280000e+02 : f32
      %35 = vector.broadcast %cst_18 : f32 to vector<8x1xf32>
      %36 = arith.divf %34, %35 : vector<8x1xf32>
      %37 = vector.broadcast %36 : vector<8x1xf32> to vector<8x128xf32>
      %38 = arith.subf %32, %37 : vector<8x128xf32>
      %39 = arith.mulf %38, %38 : vector<8x128xf32>
      %cst_19 = arith.constant dense<0.000000e+00> : vector<8xf32>
      %40 = vector.multi_reduction <add>, %39, %cst_19 [1] : vector<8x128xf32> to vector<8xf32>
      %41 = vector.shape_cast %40 : vector<8xf32> to vector<8x1xf32>
      %cst_20 = arith.constant 1.280000e+02 : f32
      %42 = vector.broadcast %cst_20 : f32 to vector<8x1xf32>
      %43 = arith.divf %41, %42 : vector<8x1xf32>
      %cst_21 = arith.constant 9.99999974E-6 : f32
      %44 = vector.broadcast %cst_21 : f32 to vector<8x1xf32>
      %45 = arith.addf %43, %44 : vector<8x1xf32>
      %46 = math.rsqrt %45 : vector<8x1xf32>
      %47 = vector.broadcast %46 : vector<8x1xf32> to vector<8x128xf32>
      %48 = arith.mulf %38, %47 : vector<8x128xf32>
      %49 = arith.index_cast %9 : i32 to index
      %c0_22 = arith.constant 0 : index
      %c0_23 = arith.constant 0 : index
      %50 = vector.load %arg6[%49, %c0_22, %c0_23] : memref<2x8x128xf32, #tpu.memory_space<vmem>>, vector<1x8x128xf32>
      %51 = vector.shape_cast %50 : vector<1x8x128xf32> to vector<8x128xf32>
      %52 = vector.shape_cast %48 : vector<8x128xf32> to vector<1x8x128xf32>
      tpu.vector_store %arg6[%49, %c0_22, %c0_23], %52 {strides = array<i32>} : memref<2x8x128xf32, #tpu.memory_space<vmem>>, vector<1x8x128xf32>,
    } else {
    }
    %c1_i32_15 = arith.constant 1 : i32
    %29 = arith.cmpi eq, %arg1, %c1_i32_15 : i32
    %30 = arith.extui %29 : i1 to i32
    %c0_i32_16 = arith.constant 0 : i32
    %31 = arith.cmpi ne, %30, %c0_i32_16 : i32
    scf.if %31 {
      %32 = arith.index_cast %20 : i32 to index
      %c0 = arith.constant 0 : index
      %c0_17 = arith.constant 0 : index
      %33 = vector.load %arg6[%32, %c0, %c0_17] : memref<2x8x128xf32, #tpu.memory_space<vmem>>, vector<1x8x128xf32>
      %34 = vector.shape_cast %33 : vector<1x8x128xf32> to vector<8x128xf32>
      %c0_18 = arith.constant 0 : index
      %c0_19 = arith.constant 0 : index
      %35 = vector.load %arg3[%c0_18, %c0_19] : memref<128x128xf32, #tpu.memory_space<vmem>>, vector<128x128xf32>
      %cst = arith.constant dense<0.000000e+00> : vector<8x128xf32>
      %36 = tpu.matmul %34, %35, %cst {dimension_numbers = #tpu.dot_dimension_numbers<[1], [0], [0], [1], [0, 0, 1, 1], [], []>} : vector<8x128xf32>, vector<128x128xf32>, vector<8x128xf32> -> vector<8x128xf32>
      %c0_20 = arith.constant 0 : index
      %c0_21 = arith.constant 0 : index
      %37 = vector.load %arg4[%c0_20, %c0_21] : memref<1x128xf32, #tpu.memory_space<vmem>>, vector<1x128xf32>
      %38 = vector.broadcast %37 : vector<1x128xf32> to vector<8x128xf32>
      %39 = arith.addf %36, %38 : vector<8x128xf32>
      %c0_22 = arith.constant 0 : index
      %c0_23 = arith.constant 0 : index
      %40 = vector.load %arg5[%c0_22, %c0_23] : memref<8x128xf32, #tpu.memory_space<vmem>>, vector<8x128xf32>
      tpu.vector_store %arg5[%c0_22, %c0_23], %39 {strides = array<i32>} : memref<8x128xf32, #tpu.memory_space<vmem>>, vector<8x128xf32>,
    } else {
    }
    return
  }
  func.func @transform_0(%arg0: i32, %arg1: i32) -> (i32, i32) {
    %c1_i32 = arith.constant 1 : i32
    %0 = arith.muli %arg0, %c1_i32 : i32
    %c0_i32 = arith.constant 0 : i32
    %1 = arith.minsi %arg1, %c0_i32 : i32
    %2 = arith.addi %0, %1 : i32
    %c1_i32_0 = arith.constant 1 : i32
    %3 = arith.minsi %2, %c1_i32_0 : i32
    %c0_i32_1 = arith.constant 0 : i32
    %c0_i32_2 = arith.constant 0 : i32
    return %3, %c0_i32_1 : i32, i32
  }
  func.func @transform_1(%arg0: i32, %arg1: i32) -> (i32, i32) {
    %c0_i32 = arith.constant 0 : i32
    %c0_i32_0 = arith.constant 0 : i32
    %c0_i32_1 = arith.constant 0 : i32
    return %c0_i32, %c0_i32_0 : i32, i32
  }
  func.func @transform_2(%arg0: i32, %arg1: i32) -> (i32, i32) {
    %c0_i32 = arith.constant 0 : i32
    %c0_i32_0 = arith.constant 0 : i32
    %c0_i32_1 = arith.constant 0 : i32
    return %c0_i32, %c0_i32_0 : i32, i32
  }
  func.func @transform_3(%arg0: i32, %arg1: i32) -> (i32, i32) {
    %c1_i32 = arith.constant 1 : i32
    %0 = arith.muli %arg0, %c1_i32 : i32
    %c1_i32_0 = arith.constant 1 : i32
    %1 = arith.subi %arg1, %c1_i32_0 : i32
    %c0_i32 = arith.constant 0 : i32
    %2 = arith.maxsi %1, %c0_i32 : i32
    %3 = arith.addi %0, %2 : i32
    %c1_i32_1 = arith.constant 1 : i32
    %4 = arith.minsi %3, %c1_i32_1 : i32
    %c0_i32_2 = arith.constant 0 : i32
    %c0_i32_3 = arith.constant 0 : i32
    return %4, %c0_i32_2 : i32, i32
  }
}

</mosaic_0001>

<bundles_post_ra>
// kernel: tpu_custom_call.1
= control target key start
LH: loop header
LB: loop body
LE: loop exit
PB: predicated region body
PF: predicated region fallthrough
CT: control target
= control target key end

     0   :  { %s1349_s0 = inlined_call_operand.hbm [shape: f32[16,128], index: 0, kind: input, shape index: {}]   ;;  %s1350_s1 = inlined_call_operand.hbm [shape: f32[128,128], index: 1, kind: input, shape index: {}]   ;;  %s1351_s2 = inlined_call_operand.vmem [shape: f32[1,128], index: 2, kind: input, shape index: {}]   ;;  %s1352_s3 = inlined_call_operand.hbm [shape: f32[16,128], index: 3, kind: output, shape index: {}]  }
   0x1   :  { %1358 = sst [smem:[#allocation17_spill]] %s1350_s1 }
   0x2   :  { %8 = vsyncpa [#allocation4], 0 }
   0x3   :  { %10 = vsyncpa [#allocation4 + $0x1], 0 }
   0x4   :  { %11 = vsyncpa [#allocation7], 0 }
   0x5   :  { %12 = vsyncpa [#allocation5], 0 }
   0x6   :  { %14 = vsyncpa [#allocation5 + $0x1], 0  ;;  %s1103_s12 = smov 0   ;;  %s1105_s13 = smov 0  }
   0x7   :  { %s1107_s14 = smov 0   ;;  %s1109_s15 = smov 0  }
   0x8   :  { %s1111_s16 = smov 0   ;;  %s1113_s17 = smov 0  }
   0x9   :  { %s1115_s18 = smov 0   ;;  %s1117_s19 = smov 0  }
   0xa   :  { %s1119_s20 = smov 0   ;;  %s1121_s21 = smov 0  }
   0xb   :  { %s1123_s22 = smov 0  }
   0xc LB: > { %1359 = sst [smem:[#allocation12_spill]] %s1064_s20  ;;  %s635_s23 = sadd.s32 4294967295, %s1072_s22   ;;  %s1072_s22 = sphi %s1123_s22, %s20_s22   ;;  %s1068_s21 = sphi %s1121_s21, %s1380_s21   ;;  %s1064_s20 = sphi %s1119_s20, %s1379_s20   ;;  %s1060_s19 = sphi %s1117_s19, %s1378_s19   ;;  %s1056_s18 = sphi %s1115_s18, %s1377_s18   ;;  %s1052_s17 = sphi %s1113_s17, %s1386_s17   ;;  %s1048_s16 = sphi %s1111_s16, %s1385_s16   ;;  %s1044_s15 = sphi %s1109_s15, %s1384_s15   ;;  %s1040_s14 = sphi %s1107_s14, %s1383_s14   ;;  %s1036_s13 = sphi %s1105_s13, %s1382_s13   ;;  %s1032_s12 = sphi %s1103_s12, %s1381_s12  }
   0xd   : > { %1360 = sst [smem:[#allocation13_spill]] %s1068_s21  ;;  %s636_s24 = sadd.s32 4294967294, %s1072_s22  }
   0xe   : > { %p62_p0 = scmp.ne.s32.totalorder %s1048_s16, %s1044_s15  ;;  %p1159_p1 = scmp.eq.s32.totalorder %s635_s23, 0 }
   0xf   : > { %p139_p2 = scmp.ne.s32.totalorder %s1040_s14, %s1036_s13  ;;  %p140_p4 = scmp.eq.s32.totalorder %s635_s23, 3 }
  0x10   : > { %p1168_p3 = por %p1159_p1, %p62_p0  ;;  %p145_p5 = scmp.ne.s32.totalorder %s1036_s13, %s1032_s12 }
  0x11   : > { %p146_p6 = scmp.eq.s32.totalorder %s636_s24, 3  ;;  %p1174_p7 = por %p140_p4, %p139_p2 }
  0x12   : > { %p639_p8 = scmp.ge.s32.totalorder %s1072_s22, 1  ;;  %p153_p10 = scmp.lt.s32.totalorder %s1072_s22, 5 }
  0x13   : > { %s1363_s28 = scalar_select %p1174_p7, 1, 0 }
  0x14   : > { %p1179_p9 = por %p146_p6, %p145_p5  ;;  %p1184_p11 = pnand %p639_p8, %p153_p10 }
  0x15   : > { %s1074_s4 = smov [#allocation6]  }
  0x16   : > { %s1364_s29 = scalar_select %p1179_p9, 1, 0 }
  0x17   : > { %s165_s5 = sshll.u32 %s1074_s4, 4  ;;  %p779_p12 = pneg %p1184_p11  ;;  %s166_s5 = int_to_ptr.vmem [resolvable:$true] %s165_s5 }
  0x18   : > { %1365 = sst [smem:[#allocation14_spill]] %s1364_s29  ;;  %s905_s6 = scalar_lea.vmem %s166_s5, 2048 }
  0x19   : > { %p780_p13 = pnand %p779_p12, %p1159_p1  ;;  %p906_p2 = scmp.ne.s32.totalorder %s166_s5, %s905_s6 }
  0x1a   : > { %p913_p6 = scmp.lt.s32.totalorder %s166_s5, %s166_s5  ;;  %p914_p9 = scmp.lt.s32.totalorder %s905_s6, %s905_s6 }
  0x1b   : > { %p896_p0 = pneg %p780_p13 }
  0x1c   : > { %p915_p7 = por %p914_p9, %p913_p6 }
  0x1d   : > { %p908_p4 = pnand %p906_p2, %p896_p0 }
  0x1f   : > { %p909_p5 = pneg %p908_p4 }
  0x21   : > { %p916_p8 = pnand %p915_p7, %p909_p5 }
  0x23   : > { %919 = shalt.err (!%p916_p8)
}
  0x24   : > { %s1075_s7 = smov 128   ;;  %s1076_s8 = smov 8  }
  0x25   : > { %s1367_s1 = sld [smem:[#allocation17_spill]]  ;;  %s29_s11 = sadd.s32 1, %s1064_s20 }
  0x26   : > { %p30_p10 = scmp.ge.s32.totalorder %s29_s11, 2  ;;  %s32_s15 = sadd.s32 1, %s1068_s21 }
  0x27   : > { %s49_s23 = sadd.s32 1, %s1052_s17  ;;  %p56_p9 = scmp.ne.s32.totalorder %s1052_s17, %s1048_s16 }
  0x28   : > { %s1388_s11 = smov (%p30_p10, %s29_s11), 0  ;;  %s1390_s15 = smov (!%p30_p10, %s32_s15), %s1068_s21 }
  0x29   : > { %1368 = sst [smem:[#allocation15_spill]] %s1388_s11  ;;  %p34_p7 = scmp.ge.s32.totalorder %s1390_s15, 2 }
  0x2a   : > { %p39_p12 = scmp.lt.s32.totalorder %s1068_s21, 1  ;;  %p57_p0 = scmp.eq.s32.totalorder %s1072_s22, 0 }
  0x2b   : > { %782 = dma.hbm_to_vmem [thread:$0]  (!%p780_p13), %s1367_s1, 2048, %s166_s5, [#allocation7], %s1075_s7, %s1075_s7, %s1076_s8  }
  0x2c   : > { %s1392_s15 = smov (%p34_p7, %s1390_s15), 0  ;;  %p1208_p13 = por %p57_p0, %p56_p9 }
  0x2d   : > { %1369 = sst [smem:[#allocation16_spill]] %s1392_s15  ;;  %p44_p2 = scmp.lt.s32.totalorder %s1392_s15, 1 }
  0x2e   : > { %s40_s24 = scalar_select %p39_p12, %s1068_s21, 1 }
  0x2f   : > { %s45_s5 = scalar_select %p44_p2, %s1392_s15, 1 }
  0x30   : > { %p792_p5 = scmp.lt.s32.totalorder %s1072_s22, 4  ;;  %s182_s9 = sand.u32 1, %s1052_s17  }
  0x31   : > { %s46_s6 = ssub.s32 %s40_s24, %s45_s5  ;;  %s643_s10 = sshll.u32 %s40_s24, 7 }
  0x32   : > { %p1214_p4 = scmp.eq.s32.totalorder %s46_s6, 0  ;;  %s642_s26 = sshll.u32 %s182_s9, 3 }
  0x33   : > { %s196_s21 = scalar_lea.hbm %s1349_s0, %s643_s10  ;;  %s186_s20 = scalar_lea.vmem [#allocation3], %s642_s26 }
  0x34   : > { %s1222_s8 = scalar_select %p1214_p4, %s1052_s17, %s49_s23  }
  0x35   : > { %s198_s29 = sshll.u32 %s186_s20, 4  ;;  %p1230_p6 = pnand %p792_p5, %p1208_p13  ;;  %s199_s29 = int_to_ptr.vmem [resolvable:$true] %s198_s29 }
  0x36   : > { %s183_s6 = scalar_lea.sflag [#allocation4], %s182_s9  ;;  %s933_s23 = scalar_lea.vmem %s199_s29, 128 }
  0x37   : > { %p922_p8 = pneg %p1230_p6  ;;  %p934_p10 = scmp.ne.s32.totalorder %s199_s29, %s933_s23 }
  0x38   : > { %s1077_s24 = smov [#allocation3]  }
  0x39   : > { %p936_p7 = pnand %p934_p10, %p922_p8  ;;  %s938_s15 = sshll.u32 %s1077_s24, 4  ;;  %s939_s15 = int_to_ptr.vmem [resolvable:$false] %s938_s15 }
  0x3a   : > { %s940_s1 = scalar_lea.vmem %s939_s15, 256  ;;  %p941_p12 = scmp.lt.s32.totalorder %s199_s29, %s939_s15 }
  0x3b   : > { %p937_p9 = pneg %p936_p7  ;;  %p942_p0 = scmp.lt.s32.totalorder %s940_s1, %s933_s23 }
  0x3d   : > { %p943_p2 = por %p942_p0, %p941_p12 }
  0x3f   : > { %p944_p13 = pnand %p943_p2, %p937_p9 }
  0x41   : > { %947 = shalt.err (!%p944_p13)
}
  0x42   : > { %786 = dma.hbm_to_vmem [thread:$0]  (!%p1230_p6), %s196_s21, 128, %s199_s29, %s183_s6  }
  0x43   : > { %s1373_s20 = sadd.s32 1, %s1040_s14  ;;  %207 = sbr.rel (%p1184_p11) target bundleno = 971 (0x3cb), region = 32 }
  0x44   : > { %s1243_s26 = scalar_select %p1214_p4, %s1040_s14, %s1373_s20  }
  0x45   : > { %s209_s11 = sand.u32 (!%p1184_p11), 1, %s1048_s16  }
  0x46   : > { %s1248_s15 = sshll.u32 (!%p1184_p11), %s209_s11, 3  ;;  %s210_s4 = scalar_lea.sflag (!%p1184_p11), [#allocation4], %s209_s11 }
  0x47   : > { %s213_s9 = scalar_lea.vmem (!%p1184_p11), [#allocation3], %s1248_s15 }
  0x48   : > { %1019 = dma.done.wait (%p1168_p3), %s210_s4, 128  }
  0x49   : > { %1021 = vsyncadd (%p1168_p3), %s210_s4, 4294967168 }
  0x4a   : > { %1023 = dma.done.wait (%p1159_p1), [#allocation7], 2048  }
  0x4b   : > { %1025 = vsyncadd (%p1159_p1), [#allocation7], 4294965248  ;;  %s237_s21 = sand.u32 1, %s1036_s13   ;;  %p251_p11 = scmp.lt.s32.totalorder %s1056_s18, 0 }
  0x4c   : > { %s647_s29 = sshll.u32 %s237_s21, 3  ;;  %s252_s27 = ssub.s32 0, %s1056_s18 }
  0x4d   : > { %s648_s30 = smin.u32 %s1056_s18, %s252_s27  ;;  %s263_s10 = sadd.s32 1, %s1056_s18 }
  0x4e   : > { %s254_s7 = sand.u32 1, %s648_s30   ;;  %p264_p3 = scmp.lt.s32.totalorder %s263_s10, 0 }
  0x4f   : > { %s255_s5 = ssub.s32 0, %s254_s7  ;;  %s265_s25 = ssub.s32 0, %s263_s10 }
  0x50   : > { %s1394_s5 = smov (!%p251_p11, %s255_s5), %s254_s7  ;;  %p276_p1 = scmp.gt.s32.totalorder %s1056_s18, 0 }
  0x51   : > { %p650_p4 = scmp.lt.s32.totalorder %s1394_s5, 0  ;;  %s261_s6 = sadd.s32 2, %s1394_s5 }
  0x52   : > { %s651_s23 = smin.u32 %s265_s25, %s263_s10  ;;  %p277_p5 = scmp.lt.s32.totalorder %s1056_s18, 1 }
  0x53   : > { %s1396_s6 = smov (!%p650_p4, %s261_s6), %s1394_s5  ;;  %s267_s24 = sand.u32 1, %s651_s23  }
  0x54   : > { %p278_p6 = pnand %p277_p5, %p276_p1  ;;  %s268_s1 = ssub.s32 0, %s267_s24 }
  0x55   : > { %s1398_s1 = smov (!%p264_p3, %s268_s1), %s267_s24  ;;  %s1272_s11 = scalar_lea.vmem [#allocation8], %s647_s29 }
  0x56   : > { %p653_p8 = scmp.lt.s32.totalorder %s1398_s1, 0  ;;  %s274_s20 = sadd.s32 2, %s1398_s1 }
  0x57   : > { %281 = sbr.rel (%p278_p6) target bundleno = 396 (0x18c), region = 44  ;;  %s656_s7 = sshll.u32 (!%p278_p6), %s1396_s6, 3 }
  0x58   : > { %s1400_s20 = smov (!%p653_p8, %s274_s20), %s1398_s1  ;;  %s393_s10 = scalar_lea.vmem (!%p278_p6), [#allocation2], %s656_s7 }
  0x59   : > { %s654_s4 = sshll.u32 (!%p278_p6), %s1400_s20, 3 }
  0x5a   : > { %s283_s29 = scalar_lea.vmem (!%p278_p6), [#allocation2], %s654_s4 }
  0x5c   : > { %v379_v0 = vld [vmem:[%s213_s9] sm:$0xff]  ;;  %v1078_v2 = vmov 0.0   ;;  %vm1079_vm0 = vmmov 0   ;;  %v298_v4 = vld [vmem:[#allocation6 + $0x68] sm:$0xff]  ;;  %v297_v5 = vld [vmem:[#allocation6 + $0x60] sm:$0xff] }
  0x5d   : > { %v300_v1 = vld [vmem:[#allocation6 + $0x78] sm:$0xff]  ;;  %380 = vadd.xlane.f32.xlu0 %v379_v0  ;;  %701 = vmatprep.subr.mxu0 %v1078_v2  ;;  %v299_v3 = vld [vmem:[#allocation6 + $0x70] sm:$0xff]  ;;  %v294_v8 = vld [vmem:[#allocation6 + $0x48] sm:$0xff] }
  0x5e   : > { %702 = vmatpush3.msra.mxu0 %v300_v1  ;;  %733 = vmatprep.mubr.msk.f32.mxu0 %vm1079_vm0, %v1078_v2  ;;  %v296_v6 = vld [vmem:[#allocation6 + $0x58] sm:$0xff]  ;;  %v295_v7 = vld [vmem:[#allocation6 + $0x50] sm:$0xff]  ;;  %v293_v9 = vld [vmem:[#allocation6 + $0x40] sm:$0xff] }
  0x5f   : > { %703 = vmatprep.subr.mxu0 %v1078_v2  ;;  %v292_v10 = vld [vmem:[#allocation6 + $0x38] sm:$0xff]  ;;  %v291_v11 = vld [vmem:[#allocation6 + $0x30] sm:$0xff]  ;;  %v290_v12 = vld [vmem:[#allocation6 + $0x28] sm:$0xff] }
  0x60   : > { %704 = vmatpush3.msra.mxu0 %v299_v3  ;;  %v289_v13 = vld [vmem:[#allocation6 + $0x20] sm:$0xff]  ;;  %v288_v14 = vld [vmem:[#allocation6 + $0x18] sm:$0xff]  ;;  %v287_v15 = vld [vmem:[#allocation6 + $0x10] sm:$0xff] }
  0x61   : > { %705 = vmatprep.subr.mxu0 %v1078_v2  ;;  %v286_v16 = vld [vmem:[#allocation6 + $0x8] sm:$0xff]  ;;  %v285_v17 = vld [vmem:[#allocation6] sm:$0xff] }
  0x62   : > { %706 = vmatpush3.msra.mxu0 %v298_v4  ;;  %v284_v18 = vld [vmem:[%s283_s29] sm:$0xff] }
  0x63   : > { %707 = vmatprep.subr.mxu0 %v1078_v2  ;;  %v655_v23 = vld [vmem:[%s1351_s2] ss:$0 sm:$0xff] }
  0x64   : > { %708 = vmatpush3.msra.mxu0 %v297_v5 }
  0x65   : > { %709 = vmatprep.subr.mxu0 %v1078_v2 }
  0x66   : > { %710 = vmatpush3.msra.mxu0 %v296_v6 }
  0x67   : > { %711 = vmatprep.subr.mxu0 %v1078_v2 }
  0x68   : > { %712 = vmatpush3.msra.mxu0 %v295_v7 }
  0x69   : > { %713 = vmatprep.subr.mxu0 %v1078_v2 }
  0x6a   : > { %714 = vmatpush3.msra.mxu0 %v294_v8 }
  0x6b   : > { %715 = vmatprep.subr.mxu0 %v1078_v2 }
  0x6c   : > { %716 = vmatpush3.msra.mxu0 %v293_v9 }
  0x6d   : > { %717 = vmatprep.subr.mxu0 %v1078_v2 }
  0x6e   : > { %718 = vmatpush3.msra.mxu0 %v292_v10 }
  0x6f   : > { %719 = vmatprep.subr.mxu0 %v1078_v2 }
  0x70   : > { %720 = vmatpush3.msra.mxu0 %v291_v11 }
  0x71   : > { %721 = vmatprep.subr.mxu0 %v1078_v2 }
  0x72   : > { %722 = vmatpush3.msra.mxu0 %v290_v12 }
  0x73   : > { %723 = vmatprep.subr.mxu0 %v1078_v2 }
  0x74   : > { %724 = vmatpush3.msra.mxu0 %v289_v13 }
  0x75   : > { %725 = vmatprep.subr.mxu0 %v1078_v2 }
  0x76   : > { %726 = vmatpush3.msra.mxu0 %v288_v14 }
  0x77   : > { %727 = vmatprep.subr.mxu0 %v1078_v2 }
  0x78   : > { %728 = vmatpush3.msra.mxu0 %v287_v15 }
  0x79   : > { %729 = vmatprep.subr.mxu0 %v1078_v2 }
  0x7a   : > { %730 = vmatpush3.msra.mxu0 %v286_v16 }
  0x7b   : > { %731 = vmatprep.subr.mxu0 %v1078_v2 }
  0x7c   : > { %732 = vmatpush3.msra.mxu0 %v285_v17 }
  0x7d   : > { %734 = vmatmul.mubr.f32.vlgmr.msra.gmra.mxu0 %v284_v18 }
  0xe6   : > { %v381_v19 = vpop.xlane.xlu0 %380 }
  0xe7   : > { %v383_v20 = vmul.f32 0.0078125, %v381_v19 }
  0xe9   : > { %v384_v21 = vsub.f32 %v379_v0, %v383_v20 }
  0xeb   : > { %v385_v22 = vmul.f32 %v384_v21, %v384_v21 }
  0xed   : > { %386 = vadd.xlane.f32.xlu0 %v385_v22 }
 0x13d   : > { %v374_v24 = vpop.f32.mrf.mxu0 }
 0x13e   : > { %v375_v25 = vadd.f32 %v655_v23, %v374_v24 }
 0x13f   : > { %v735_v26 = vpop.f32.mrf.mxu0 }
 0x140   : > { %378 = vst [vmem:[%s1272_s11] sm:$0xff] %v375_v25 }
 0x176   : > { %v387_v27 = vpop.xlane.xlu0 %386 }
 0x177   : > { %v388_v28 = vmul.f32 0.0078125, %v387_v27 }
 0x179   : > { %v389_v29 = vadd.f32 1e-05, %v388_v28 }
 0x17b   : > { %890 = vrsqrt.f32 %v389_v29 }
 0x188   : > { %v891_v30 = vpop.eup %890 }
 0x189   : > { %v391_v31 = vmul.f32 %v891_v30, %v384_v21 }
 0x18b   : > { %394 = vst [vmem:[%s393_s10] sm:$0xff] %v391_v31 }
 0x18c PF: > { %p657_p10 = scmp.ne.s32.totalorder %s1056_s18, 0 }
 0x18d   : > { %s658_s5 = sshll.u32 (!%p657_p10), %s1396_s6, 3 }
 0x18e   : > { %398 = sbr.rel (%p657_p10) target bundleno = 707 (0x2c3), region = 48  ;;  %s413_s25 = scalar_lea.vmem (!%p657_p10), [#allocation2], %s658_s5 }
 0x193   : > { %v399_v32 = vld [vmem:[%s213_s9] sm:$0xff] }
 0x194   : > { %400 = vadd.xlane.f32.xlu0 %v399_v32 }
 0x21d   : > { %v401_v33 = vpop.xlane.xlu0 %400 }
 0x21e   : > { %v403_v34 = vmul.f32 0.0078125, %v401_v33 }
 0x220   : > { %v404_v35 = vsub.f32 %v399_v32, %v403_v34 }
 0x222   : > { %v405_v36 = vmul.f32 %v404_v35, %v404_v35 }
 0x224   : > { %406 = vadd.xlane.f32.xlu0 %v405_v36 }
 0x2ad   : > { %v407_v37 = vpop.xlane.xlu0 %406 }
 0x2ae   : > { %v408_v38 = vmul.f32 0.0078125, %v407_v37 }
 0x2b0   : > { %v409_v39 = vadd.f32 1e-05, %v408_v38 }
 0x2b2   : > { %892 = vrsqrt.f32 %v409_v39 }
 0x2bf   : > { %v893_v40 = vpop.eup %892 }
 0x2c0   : > { %v411_v41 = vmul.f32 %v893_v40, %v404_v35 }
 0x2c2   : > { %414 = vst [vmem:[%s413_s25] sm:$0xff] %v411_v41 }
 0x2c3 PF: > { %p659_p7 = scmp.ne.s32.totalorder %s1056_s18, 1 }
 0x2c4   : > { %s660_s15 = sshll.u32 (!%p659_p7), %s1400_s20, 3 }
 0x2c5   : > { %418 = sbr.rel (%p659_p7) target bundleno = 943 (0x3af), region = 52  ;;  %s420_s9 = scalar_lea.vmem (!%p659_p7), [#allocation2], %s660_s15 }
 0x2ca   : > { %v437_v42 = vld [vmem:[#allocation6 + $0x78] sm:$0xff]  ;;  %v1080_v43 = vmov 0.0   ;;  %v436_v44 = vld [vmem:[#allocation6 + $0x70] sm:$0xff]  ;;  %vm1081_vm1 = vmmov 0   ;;  %v435_v45 = vld [vmem:[#allocation6 + $0x68] sm:$0xff] }
 0x2cb   : > { %736 = vmatprep.subr.mxu0 %v1080_v43  ;;  %768 = vmatprep.mubr.msk.f32.mxu0 %vm1081_vm1, %v1080_v43  ;;  %v434_v46 = vld [vmem:[#allocation6 + $0x60] sm:$0xff]  ;;  %v433_v47 = vld [vmem:[#allocation6 + $0x58] sm:$0xff]  ;;  %v432_v48 = vld [vmem:[#allocation6 + $0x50] sm:$0xff] }
 0x2cc   : > { %737 = vmatpush3.msra.mxu0 %v437_v42  ;;  %v431_v49 = vld [vmem:[#allocation6 + $0x48] sm:$0xff]  ;;  %v430_v50 = vld [vmem:[#allocation6 + $0x40] sm:$0xff]  ;;  %v429_v51 = vld [vmem:[#allocation6 + $0x38] sm:$0xff] }
 0x2cd   : > { %738 = vmatprep.subr.mxu0 %v1080_v43  ;;  %v428_v52 = vld [vmem:[#allocation6 + $0x30] sm:$0xff]  ;;  %v427_v53 = vld [vmem:[#allocation6 + $0x28] sm:$0xff]  ;;  %v426_v54 = vld [vmem:[#allocation6 + $0x20] sm:$0xff] }
 0x2ce   : > { %739 = vmatpush3.msra.mxu0 %v436_v44  ;;  %v425_v55 = vld [vmem:[#allocation6 + $0x18] sm:$0xff]  ;;  %v424_v56 = vld [vmem:[#allocation6 + $0x10] sm:$0xff]  ;;  %v423_v57 = vld [vmem:[#allocation6 + $0x8] sm:$0xff] }
 0x2cf   : > { %740 = vmatprep.subr.mxu0 %v1080_v43  ;;  %v422_v58 = vld [vmem:[#allocation6] sm:$0xff] }
 0x2d0   : > { %741 = vmatpush3.msra.mxu0 %v435_v45  ;;  %v421_v59 = vld [vmem:[%s420_s9] sm:$0xff] }
 0x2d1   : > { %742 = vmatprep.subr.mxu0 %v1080_v43  ;;  %v661_v60 = vld [vmem:[%s1351_s2] ss:$0 sm:$0xff] }
 0x2d2   : > { %743 = vmatpush3.msra.mxu0 %v434_v46 }
 0x2d3   : > { %744 = vmatprep.subr.mxu0 %v1080_v43 }
 0x2d4   : > { %745 = vmatpush3.msra.mxu0 %v433_v47 }
 0x2d5   : > { %746 = vmatprep.subr.mxu0 %v1080_v43 }
 0x2d6   : > { %747 = vmatpush3.msra.mxu0 %v432_v48 }
 0x2d7   : > { %748 = vmatprep.subr.mxu0 %v1080_v43 }
 0x2d8   : > { %749 = vmatpush3.msra.mxu0 %v431_v49 }
 0x2d9   : > { %750 = vmatprep.subr.mxu0 %v1080_v43 }
 0x2da   : > { %751 = vmatpush3.msra.mxu0 %v430_v50 }
 0x2db   : > { %752 = vmatprep.subr.mxu0 %v1080_v43 }
 0x2dc   : > { %753 = vmatpush3.msra.mxu0 %v429_v51 }
 0x2dd   : > { %754 = vmatprep.subr.mxu0 %v1080_v43 }
 0x2de   : > { %755 = vmatpush3.msra.mxu0 %v428_v52 }
 0x2df   : > { %756 = vmatprep.subr.mxu0 %v1080_v43 }
 0x2e0   : > { %757 = vmatpush3.msra.mxu0 %v427_v53 }
 0x2e1   : > { %758 = vmatprep.subr.mxu0 %v1080_v43 }
 0x2e2   : > { %759 = vmatpush3.msra.mxu0 %v426_v54 }
 0x2e3   : > { %760 = vmatprep.subr.mxu0 %v1080_v43 }
 0x2e4   : > { %761 = vmatpush3.msra.mxu0 %v425_v55 }
 0x2e5   : > { %762 = vmatprep.subr.mxu0 %v1080_v43 }
 0x2e6   : > { %763 = vmatpush3.msra.mxu0 %v424_v56 }
 0x2e7   : > { %764 = vmatprep.subr.mxu0 %v1080_v43 }
 0x2e8   : > { %765 = vmatpush3.msra.mxu0 %v423_v57 }
 0x2e9   : > { %766 = vmatprep.subr.mxu0 %v1080_v43 }
 0x2ea   : > { %767 = vmatpush3.msra.mxu0 %v422_v58 }
 0x2eb   : > { %769 = vmatmul.mubr.f32.vlgmr.msra.gmra.mxu0 %v421_v59 }
 0x3ab   : > { %v511_v61 = vpop.f32.mrf.mxu0 }
 0x3ac   : > { %v512_v62 = vadd.f32 %v661_v60, %v511_v61 }
 0x3ad   : > { %v770_v63 = vpop.f32.mrf.mxu0 }
 0x3ae   : > { %515 = vst [vmem:[%s1272_s11] sm:$0xff] %v512_v62 }
 0x3af PF: > { %s663_s24 = sadd.s32 4294967295, %s1056_s18  ;;  %s536_s20 = sshll.u32 %s1272_s11, 4  ;;  %s537_s20 = int_to_ptr.vmem [resolvable:$true] %s536_s20 }
 0x3b0   : > { %p525_p9 = scmp.gt.s32.totalorder %s663_s24, 0  ;;  %s517_s7 = scalar_lea.sflag [#allocation5], %s237_s21 }
 0x3b1   : > { %s948_s10 = scalar_lea.vmem %s537_s20, 128  ;;  %p1374_p2 = scmp.ne.s32.totalorder %s1363_s28, 0 }
 0x3b2   : > { %s1402_s24 = smov (!%p525_p9, %s663_s24), 0  ;;  %p949_p0 = scmp.ne.s32.totalorder %s537_s20, %s948_s10 }
 0x3b3   : > { %s527_s1 = sadd.s32 %s1060_s19, %s1402_s24  ;;  %s1082_s18 = smov [#allocation8]  }
 0x3b4   : > { %p528_p12 = scmp.lt.s32.totalorder %s527_s1, 1  ;;  %p950_p13 = pnand %p949_p0, %p1374_p2 }
 0x3b5   : > { %s952_s5 = sshll.u32 %s1082_s18, 4  ;;  %s953_s5 = int_to_ptr.vmem [resolvable:$false] %s952_s5 }
 0x3b6   : > { %s1404_s1 = smov (!%p528_p12, %s527_s1), 1  ;;  %p951_p11 = pneg %p950_p13 }
 0x3b7   : > { %s664_s4 = sshll.u32 %s1404_s1, 7  ;;  %s954_s19 = scalar_lea.vmem %s953_s5, 256 }
 0x3b8   : > { %s534_s30 = scalar_lea.hbm %s1352_s3, %s664_s4  ;;  %p955_p3 = scmp.lt.s32.totalorder %s537_s20, %s953_s5 }
 0x3b9   : > { %p956_p1 = scmp.lt.s32.totalorder %s954_s19, %s948_s10 }
 0x3bb   : > { %p957_p4 = por %p956_p1, %p955_p3 }
 0x3bd   : > { %p958_p5 = pnand %p957_p4, %p951_p11 }
 0x3bf   : > { %961 = shalt.err (!%p958_p5)
}
 0x3c0   : > { %s962_s11 = scalar_lea.hbm %s534_s30, 128  ;;  %s966_s15 = scalar_lea.hbm %s1352_s3, 256 }
 0x3c1   : > { %p963_p6 = scmp.ne.s32.totalorder %s534_s30, %s962_s11  ;;  %p967_p7 = scmp.lt.s32.totalorder %s534_s30, %s1352_s3 }
 0x3c2   : > { %p968_p9 = scmp.lt.s32.totalorder %s966_s15, %s962_s11 }
 0x3c3   : > { %p964_p8 = pnand %p963_p6, %p1374_p2 }
 0x3c4   : > { %p969_p12 = por %p968_p9, %p967_p7 }
 0x3c5   : > { %p965_p10 = pneg %p964_p8 }
 0x3c7   : > { %p970_p0 = pnand %p969_p12, %p965_p10 }
 0x3c9   : > { %973 = shalt.err (!%p970_p0)
}
 0x3ca   : > { %777 = dma.vmem_to_hbm [thread:$0]  (%p1374_p2), %s537_s20, 128, %s534_s30, %s517_s7  }
 0x3cb PF: > { %s1375_s23 = sld [smem:[#allocation14_spill]]  ;;  %p794_p13 = scmp.ge.s32.totalorder %s1072_s22, 2 }
 0x3cc   : > { %s548_s24 = sand.u32 1, %s1032_s12  }
 0x3cd   : > { %s549_s1 = scalar_lea.sflag [#allocation5], %s548_s24 }
 0x3d1   : > { %p1376_p11 = scmp.ne.s32.totalorder %s1375_s23, 0 }
 0x3d3   : > { %p788_p3 = pnand %p794_p13, %p1376_p11 }
 0x3d5   : > { %p789_p1 = pneg %p788_p3 }
 0x3d7   : > { %1027 = dma.done.wait (%p789_p1), %s549_s1, 128  }
 0x3d8   : > { %1029 = vsyncadd (%p789_p1), %s549_s1, 4294967168  ;;  %s20_s22 = sadd.s32 1, %s1072_s22   ;;  %s1377_s18 = sld [smem:[#allocation12_spill]] }
 0x3d9   : > { %p17_p4 = scmp.ge.s32.totalorder %s20_s22, 6   ;;  %s1378_s19 = sld [smem:[#allocation13_spill]] }
 0x3da   : > { %s1379_s20 = sld [smem:[#allocation15_spill]]  ;;  %s1381_s12 = smov %s1036_s13 }
 0x3db   : > { %s1380_s21 = sld [smem:[#allocation16_spill]]  ;;  %s1382_s13 = smov %s1040_s14 }
 0x3dc   : > { %s1383_s14 = smov %s1243_s26  ;;  %s1384_s15 = smov %s1048_s16 }
 0x3dd   : > { %s1385_s16 = smov %s1052_s17  ;;  %s1386_s17 = smov %s1222_s8 }
 0x3de   :  { %19 = sbr.rel (!%p17_p4) target bundleno = 12 (0xc), region = 97 }
 0x3e3   :  { %554 = vsyncpa [#allocation4], 1 }
 0x3e4   :  { %556 = vsyncpa [#allocation4 + $0x1], 1 }
 0x3e5   :  { %557 = vsyncpa [#allocation7], 1 }
 0x3e6   :  { %558 = vsyncpa [#allocation5], 1 }
 0x3e7   :  { %560 = vsyncpa [#allocation5 + $0x1], 1 }

</bundles_post_ra>
